<compile_context>
chip_gen: v7x
topology: tpu7x:2x2x1
jax: 0.10.0
libtpu: 0.0.40
codegen_flags: <defaults>
</compile_context>

<pallas_src>
import math
import numpy as np

import jax
import jax.numpy as jnp
from jax.experimental import pallas as pl
from jax.experimental.pallas import tpu as pltpu


# ----------------------------------------------------------------------------
# Pallas kernel
# ----------------------------------------------------------------------------

def _pos_enc_kernel(x_ref, pe_ref, o_ref):
    # x_ref, pe_ref, o_ref : (ts, B*D) lane-dense tiles. Pure VPU add, HBM-bound.
    o_ref[...] = x_ref[...] + pe_ref[...]


def _round_up(x, m):
    return ((x + m - 1) // m) * m


def _pick_seq_tile(S, lane, itemsize, *, per_block_budget=2 << 20, min_grid_steps=8):
    """Pick a seq-tile length ts (multiple of 8, or == S when S < 8).

    Budgets *padded* bytes (lane rounded up to 128) so that the double-buffered
    pipeline (2 x (x + pe + out) blocks ~= 6 x block) stays well under the 16 MiB
    v5e scoped-VMEM default, and caps ts so the grid has >= min_grid_steps tiles
    when S is large enough (pipelining + v7x 2-TC sharding of the parallel axis).
    """
    lane_pad = _round_up(lane, 128)
    row_bytes = lane_pad * itemsize
    ts_vmem = max(8, per_block_budget // row_bytes)          # VMEM-driven cap
    ts_steps = max(8, _round_up(pl.cdiv(S, min_grid_steps), 8))  # keep >= ~8 grid steps
    ts = min(ts_vmem, ts_steps, _round_up(max(S, 1), 8))
    ts = max(8, (ts // 8) * 8)                               # multiple of 8
    if S < 8:
        return int(S)                                        # full-dim block, no constraint
    return int(min(ts, S))


def positional_encoding(x, pe):
    """x: (S, B, D), pe: (max_len, 1, D) -> x + pe[:S] (broadcast over batch)."""
    S, B, D = x.shape
    lane = B * D

    # Lane-dense 2D views. x.reshape is a contiguous collapse of the trailing dims
    # (free); pe2 is a one-time, tiny constant-style XLA op (S * B * D elements).
    x2 = x.reshape(S, lane)
    pe2 = jnp.tile(pe[:S, 0, :].astype(x.dtype), (1, B))     # (S, B*D), pe2[s, b*D+d] = pe[s, d]

    ts = _pick_seq_tile(S, lane, x.dtype.itemsize)
    grid = (pl.cdiv(S, ts),)

    out2 = pl.pallas_call(
        _pos_enc_kernel,
        grid=grid,
        in_specs=[
            # Last block dim equals the full array dim (B*D) -> no (8,128) issue;
            # seq tile ts is a multiple of 8 (or == S when S < 8).
            pl.BlockSpec((ts, lane), lambda i: (i, 0)),
            pl.BlockSpec((ts, lane), lambda i: (i, 0)),
        ],
        out_specs=pl.BlockSpec((ts, lane), lambda i: (i, 0)),
        out_shape=jax.ShapeDtypeStruct((S, lane), x.dtype),
        compiler_params=pltpu.CompilerParams(
            dimension_semantics=("parallel",)),
    )(x2, pe2)

    return out2.reshape(S, B, D)


# ----------------------------------------------------------------------------
# Positional table (identical construction to the PyTorch buffer)
# ----------------------------------------------------------------------------

def make_pe(d_model, max_len=5000):
    position = np.arange(max_len, dtype=np.float32)[:, None]
    div_term = np.exp(np.arange(0, d_model, 2, dtype=np.float32)
                      * (-math.log(10000.0) / d_model))
    pe = np.zeros((max_len, 1, d_model), dtype=np.float32)
    pe[:, 0, 0::2] = np.sin(position * div_term)
    pe[:, 0, 1::2] = np.cos(position * div_term)
    return jnp.asarray(pe)


def positional_encoding_forward(x, pe):
    """Module forward: x + pe[:x.size(0)]; dropout = identity (eval)."""
    return positional_encoding(x, pe)


# ----------------------------------------------------------------------------
# Demo
# ----------------------------------------------------------------------------

if __name__ == "__main__":
    d_model = 64
    max_len = 5000          # module default
    S, B = 8, 2             # x: [seq_len, batch_size, embedding_dim]

    key = jax.random.PRNGKey(0)
    x = jax.random.normal(key, (S, B, d_model), jnp.float32)
    pe = make_pe(d_model, max_len)

    fwd = jax.jit(positional_encoding_forward)
    out = fwd(x, pe)
    out = jax.block_until_ready(out)

    # Reference (plain JAX) check of the forward semantics.
    ref = x + pe[:S]
    assert out.shape == (S, B, d_model), out.shape
    assert bool(jnp.all(jnp.isfinite(out)))
    np.testing.assert_allclose(np.asarray(out), np.asarray(ref), rtol=1e-6, atol=1e-6)
    print("KERNEL_OK")
</pallas_src>

<mosaic_0001>
module attributes {stable_mosaic.version = 11 : i64} {
  func.func @_pos_enc_kernel(%arg0: i32, %arg1: memref<8x128xf32, #tpu.memory_space<vmem>>, %arg2: memref<8x128xf32, #tpu.memory_space<vmem>>, %arg3: memref<8x128xf32, #tpu.memory_space<vmem>>) attributes {dimension_semantics = [#tpu.dimension_semantics<parallel>], iteration_bounds = array<i64: 1>, scalar_prefetch = 0 : i64, scratch_operands = 0 : i64, tpu.core_type = #tpu.core_type<tc>, window_params = [{transform_indices = @transform_0, window_bounds = array<i64: 8, 128>}, {transform_indices = @transform_1, window_bounds = array<i64: 8, 128>}, {transform_indices = @transform_2, window_bounds = array<i64: 8, 128>}]} {
    %c0 = arith.constant 0 : index
    %c0_0 = arith.constant 0 : index
    %0 = vector.load %arg1[%c0, %c0_0] : memref<8x128xf32, #tpu.memory_space<vmem>>, vector<8x128xf32>
    %c0_1 = arith.constant 0 : index
    %c0_2 = arith.constant 0 : index
    %1 = vector.load %arg2[%c0_1, %c0_2] : memref<8x128xf32, #tpu.memory_space<vmem>>, vector<8x128xf32>
    %2 = arith.addf %0, %1 : vector<8x128xf32>
    %c0_3 = arith.constant 0 : index
    %c0_4 = arith.constant 0 : index
    %3 = vector.load %arg3[%c0_3, %c0_4] : memref<8x128xf32, #tpu.memory_space<vmem>>, vector<8x128xf32>
    tpu.vector_store %arg3[%c0_3, %c0_4], %2 {strides = array<i32>} : memref<8x128xf32, #tpu.memory_space<vmem>>, vector<8x128xf32>,
    return
  }
  func.func @transform_0(%arg0: i32) -> (i32, i32) {
    %c0_i32 = arith.constant 0 : i32
    %c0_i32_0 = arith.constant 0 : i32
    return %arg0, %c0_i32 : i32, i32
  }
  func.func @transform_1(%arg0: i32) -> (i32, i32) {
    %c0_i32 = arith.constant 0 : i32
    %c0_i32_0 = arith.constant 0 : i32
    return %arg0, %c0_i32 : i32, i32
  }
  func.func @transform_2(%arg0: i32) -> (i32, i32) {
    %c0_i32 = arith.constant 0 : i32
    %c0_i32_0 = arith.constant 0 : i32
    return %arg0, %c0_i32 : i32, i32
  }
}

</mosaic_0001>

<bundles_post_ra>
// kernel: tile.7
= control target key start
LH: loop header
LB: loop body
LE: loop exit
PB: predicated region body
PF: predicated region fallthrough
CT: control target
= control target key end

     0   :  { %vm42_vm0 = vcmask 1047556   ;;  %vm44_vm1 = vcmask 523264   ;;  %vm54_vm2 = vcmask 1048064   ;;  %s111_s0 = inlined_call_operand.vmem [shape: f32[8,2,64], index: 0, kind: input, shape index: {}]   ;;  %s112_s1 = inlined_call_operand.vmem [shape: f32[8,128], index: 1, kind: output, shape index: {}]  }
   0x1   :  { %v62_v0 = vld [vmem:[%s111_s0 + $0xe] sm:$0x3]  ;;  %v63_v1 = vld [vmem:[%s111_s0 + $0xc] sm:$0x3]  ;;  %v64_v2 = vld [vmem:[%s111_s0 + $0xa] sm:$0x3] }
   0x2   :  { %8 = vst [vmem:[#allocation0 + $0x38] sm:$0x3] %v62_v0  ;;  %13 = vst [vmem:[#allocation0 + $0x30] sm:$0x3] %v63_v1  ;;  %v65_v3 = vld [vmem:[%s111_s0 + $0x8] sm:$0x3] }
   0x3   :  { %18 = vst [vmem:[#allocation0 + $0x28] sm:$0x3] %v64_v2  ;;  %v66_v4 = vld [vmem:[%s111_s0 + $0x6] sm:$0x3]  ;;  %v67_v5 = vld [vmem:[%s111_s0 + $0x4] sm:$0x3] }
   0x4   :  { %23 = vst [vmem:[#allocation0 + $0x20] sm:$0x3] %v65_v3  ;;  %28 = vst [vmem:[#allocation0 + $0x18] sm:$0x3] %v66_v4  ;;  %v68_v6 = vld [vmem:[%s111_s0 + $0x2] sm:$0x3] }
   0x5   :  { %33 = vst [vmem:[#allocation0 + $0x10] sm:$0x3] %v67_v5  ;;  %v38_v7 = vld [vmem:[%s111_s0] sm:$0x3]  ;;  %37 = vst [vmem:[#allocation0 + $0x8] sm:$0x3] %v68_v6 }
   0x6   :  { %39 = vst [vmem:[#allocation0] sm:$0x3] %v38_v7  ;;  %s70_s0 = smov 64  }
   0xb   :  { %v41_v8 = vld [vmem:[#allocation0] ss:$8 sm:$0xf0]   ;;  %v49_v9 = vld [vmem:[#allocation0 + $0x1] ss:$8 sm:$0xf0]  }
   0xd   :  { %v40_v10 = vld [vmem:[#allocation0] ss:$8 sm:$0xf]   ;;  %v47_v11 = vld [vmem:[#allocation0 + $0x1] ss:$8 sm:$0xf]  }
   0xe   :  { %v43_v12 = vsel %vm42_vm0, %v41_v8, %v40_v10  ;;  %v51_v13 = vsel %vm42_vm0, %v49_v9, %v47_v11 }
   0xf   :  { %52 = vrot.lane.b32.xlu0 %v51_v13, %s70_s0  ;;  %45 = vst.msk [vmem:[%s112_s1] sm:$0xff] %vm44_vm1, %v43_v12  }
  0x81   :  { %v53_v14 = vpop.permute.xlu0 %52  }
  0x82   :  { %55 = vst.msk [vmem:[%s112_s1] sm:$0xff] %vm54_vm2, %v53_v14  }

// kernel: positional_encoding_forward.1
= control target key start
LH: loop header
LB: loop body
LE: loop exit
PB: predicated region body
PF: predicated region fallthrough
CT: control target
= control target key end

     0   :  { %s43_s0 = inlined_call_operand.vmem [shape: f32[8,128], index: 0, kind: input, shape index: {}]   ;;  %s44_s1 = inlined_call_operand.vmem [shape: f32[8,128], index: 1, kind: input, shape index: {}]   ;;  %s45_s2 = inlined_call_operand.vmem [shape: f32[8,128], index: 2, kind: output, shape index: {}]  }
   0x1   :  { %v11_v0 = vld [vmem:[%s43_s0] sm:$0xff] }
   0x2   :  { %v12_v1 = vld [vmem:[%s44_s1] sm:$0xff] }
   0x3   :  { %v13_v2 = vadd.f32 %v12_v1, %v11_v0 }
   0x5   :  { %14 = vst [vmem:[%s45_s2] sm:$0xff] %v13_v2 }

</bundles_post_ra>
